<compile_context>
chip_gen: v6e
topology: v6e:2x2x1
jax: 0.10.0
libtpu: 0.0.40
codegen_flags: <defaults>
</compile_context>

<pallas_src>
import functools
import math

import jax
import jax.numpy as jnp
from jax.experimental import pallas as pl
from jax.experimental.pallas import tpu as pltpu


def _round_up(x, m):
    return (x + m - 1) // m * m


def _std_normal(shape):
    """iid N(0,1) f32 samples from the (already seeded) TPU hardware PRNG."""
    if hasattr(pltpu, "stateful_normal"):
        return pltpu.stateful_normal(shape, jnp.float32)
    # Box-Muller fallback (EUP/VPU work). Draw bits for only half the lane
    # columns and emit both r*cos and r*sin; use mantissa-trick uniforms.
    tb, ts = shape
    half = ts // 2                       # ts is a multiple of 128 -> even
    b1 = pltpu.prng_random_bits((tb, half))
    b2 = pltpu.prng_random_bits((tb, half))
    if b1.dtype != jnp.uint32:
        b1 = pltpu.bitcast(b1, jnp.uint32)
        b2 = pltpu.bitcast(b2, jnp.uint32)
    one_bits = jnp.uint32(0x3F800000)
    f1 = pltpu.bitcast((b1 >> 9) | one_bits, jnp.float32)     # [1, 2)
    f2 = pltpu.bitcast((b2 >> 9) | one_bits, jnp.float32)     # [1, 2)
    u1 = jnp.float32(2.0) - f1                                 # (0, 1] -> log-safe
    theta = jnp.float32(2.0 * math.pi) * (f2 - jnp.float32(1.0))
    r = jnp.sqrt(jnp.float32(-2.0) * jnp.log(u1))
    return jnp.concatenate([r * jnp.cos(theta), r * jnp.sin(theta)], axis=-1)


def _sampler_prng_kernel(seed_ref, loc_ref, scale_ref, out_ref):
    # seed_ref: SMEM (1,) int32 (scalar-prefetched)
    # loc_ref/scale_ref: (tb, 1)   out_ref: (tb, ts)
    i = pl.program_id(0)
    j = pl.program_id(1)
    tile_id = i * pl.num_programs(1) + j
    # Two-word seeding: distinct, non-overlapping stream per tile, independent
    # of grid execution order, no int32 wraparound.
    pltpu.prng_seed(seed_ref[0], tile_id)
    eps = _std_normal(out_ref.shape)                  # f32 N(0,1)
    loc = loc_ref[...].astype(jnp.float32)            # (tb, 1) broadcasts on lanes
    scale = scale_ref[...].astype(jnp.float32)
    out_ref[...] = (loc + scale * eps).astype(out_ref.dtype)


def _sampler_affine_kernel(loc_ref, scale_ref, eps_ref, out_ref):
    # Portable path: noise is streamed in (used off-TPU / interpret only).
    loc = loc_ref[...].astype(jnp.float32)
    scale = scale_ref[...].astype(jnp.float32)
    eps = eps_ref[...].astype(jnp.float32)
    out_ref[...] = (loc + scale * eps).astype(out_ref.dtype)


def _tiling(B, S, dtype, max_tb, max_ts):
    # dtype-aware sublane multiple: 8 rows f32, 16 bf16/f16, 32 int8/fp8.
    itemsize = jnp.dtype(dtype).itemsize
    sub = 8 * (4 // max(1, itemsize))
    nb = pl.cdiv(B, max_tb)
    tb = _round_up(pl.cdiv(B, nb), sub)
    ns = pl.cdiv(S, max_ts)
    ts = _round_up(pl.cdiv(S, ns), 128)
    # v7x has 2 TensorCores: make sure a non-trivial problem yields >= 2 grid
    # steps along a "parallel" axis so the second core is not idle.
    if nb * ns == 1 and B * S * itemsize > 256 * 1024:
        if S >= 256:
            ns = 2
            ts = _round_up(pl.cdiv(S, ns), 128)
        elif B >= 2 * sub:
            nb = 2
            tb = _round_up(pl.cdiv(B, nb), sub)
    return nb, tb, ns, ts


@functools.partial(
    jax.jit, static_argnames=("output_size", "use_tpu_prng", "max_tb", "max_ts"))
def sampler_normal_pallas(parameters, seed, output_size, *,
                          use_tpu_prng, max_tb=256, max_ts=2048):
    """parameters: (B, 2) with columns [loc, scale]; returns (B, output_size).

    out[b, s] = loc[b] + scale[b] * eps[b, s],  eps ~ N(0,1).
    """
    B, P = parameters.shape
    assert P == 2, "only Normal(loc, scale) (nr_parameters=2) implemented"
    dtype = parameters.dtype
    S = int(output_size)
    itemsize = jnp.dtype(dtype).itemsize

    nb, tb, ns, ts = _tiling(B, S, dtype, max_tb, max_ts)
    B_pad, S_pad = nb * tb, ns * ts

    # Pre-split parameters into clean (B_pad, 1) operands (no in-kernel masked
    # lane slicing of a 2-wide column).
    loc = parameters[:, 0:1]
    scale = parameters[:, 1:2]
    if B_pad != B:
        loc = jnp.pad(loc, ((0, B_pad - B), (0, 0)))
        scale = jnp.pad(scale, ((0, B_pad - B), (0, 0)))

    grid = (nb, ns)  # sample axis innermost -> param block index constant over j
    out_shape = jax.ShapeDtypeStruct((B_pad, S_pad), dtype)
    compiler_params = pltpu.CompilerParams(
        dimension_semantics=("parallel", "parallel"))

    if use_tpu_prng:
        seed_arr = jnp.asarray(seed, dtype=jnp.int32).reshape((1,))
        cost = pl.CostEstimate(
            flops=2 * B_pad * S_pad,
            transcendentals=3 * B_pad * S_pad,   # upper bound (Box-Muller path)
            bytes_accessed=B_pad * S_pad * itemsize + 2 * B_pad * itemsize)
        out = pl.pallas_call(
            _sampler_prng_kernel,
            out_shape=out_shape,
            grid_spec=pltpu.PrefetchScalarGridSpec(
                num_scalar_prefetch=1,
                grid=grid,
                in_specs=[
                    pl.BlockSpec((tb, 1), lambda i, j, s_ref: (i, 0)),
                    pl.BlockSpec((tb, 1), lambda i, j, s_ref: (i, 0)),
                ],
                out_specs=pl.BlockSpec((tb, ts), lambda i, j, s_ref: (i, j)),
            ),
            compiler_params=compiler_params,
            cost_estimate=cost,
        )(seed_arr, loc, scale)
    else:
        # Portable path (CPU / interpret): TPU hardware-PRNG primitives have
        # no lowering here, so stream precomputed N(0,1) noise through the
        # same tiling and do the affine transform in-kernel.
        eps = jax.random.normal(
            jax.random.PRNGKey(seed), (B_pad, S_pad), dtype=jnp.float32)
        out = pl.pallas_call(
            _sampler_affine_kernel,
            out_shape=out_shape,
            grid=grid,
            in_specs=[
                pl.BlockSpec((tb, 1), lambda i, j: (i, 0)),
                pl.BlockSpec((tb, 1), lambda i, j: (i, 0)),
                pl.BlockSpec((tb, ts), lambda i, j: (i, j)),
            ],
            out_specs=pl.BlockSpec((tb, ts), lambda i, j: (i, j)),
            compiler_params=compiler_params,
        )(loc, scale, eps)

    if B_pad != B or S_pad != S:
        out = out[:B, :S]
    return out


class Sampler:
    """JAX/Pallas port of the PyTorch Sampler module (dist = Normal only)."""
    # TODO(synk): generic torch.distributions support (only Normal.rsample implemented).

    def __init__(self, dist, nr_parameters, output_size):
        assert dist == "normal", "only the Normal distribution is supported"
        assert nr_parameters == 2
        self.nr_parameters = nr_parameters
        self.output_size = output_size

    def __call__(self, parameters, key):
        # parameters: (B, nr_parameters) -> out: (B, output_size)
        seed = jax.random.randint(
            key, (), 0, jnp.iinfo(jnp.int32).max, dtype=jnp.int32)
        use_tpu_prng = jax.default_backend() == "tpu"
        return sampler_normal_pallas(
            parameters, seed, self.output_size, use_tpu_prng=use_tpu_prng)


if __name__ == "__main__":
    key = jax.random.PRNGKey(0)
    k_loc, k_scale, k_seed = jax.random.split(key, 3)

    B = 16              # batch
    nr_parameters = 2   # Normal: (loc, scale)
    output_size = 256   # samples per batch element

    loc = jax.random.normal(k_loc, (B,), dtype=jnp.float32)
    scale = jax.nn.softplus(jax.random.normal(k_scale, (B,), dtype=jnp.float32)) + 0.1
    parameters = jnp.stack([loc, scale], axis=1)   # (B, 2)

    sampler = Sampler("normal", nr_parameters, output_size)
    out = jax.block_until_ready(sampler(parameters, k_seed))
    assert out.shape == (B, output_size)

    # 1) Determinism: same key -> bit-identical output.
    out2 = jax.block_until_ready(sampler(parameters, k_seed))
    assert bool(jnp.array_equal(out, out2)), "non-deterministic output"

    # 2) Affine reparameterization check: recover the noise by re-running the
    #    same kernel with loc=0, scale=1 (same seed, same shapes -> same noise
    #    stream), then verify out == loc + scale * eps.
    use_tpu_prng = jax.default_backend() == "tpu"
    seed = jax.random.randint(
        k_seed, (), 0, jnp.iinfo(jnp.int32).max, dtype=jnp.int32)
    std_params = jnp.stack(
        [jnp.zeros((B,), jnp.float32), jnp.ones((B,), jnp.float32)], axis=1)
    eps_k = jax.block_until_ready(
        sampler_normal_pallas(std_params, seed, output_size,
                              use_tpu_prng=use_tpu_prng))
    ref = loc[:, None] + scale[:, None] * eps_k
    assert jnp.allclose(out, ref, atol=1e-5, rtol=1e-5), "mismatch vs affine reference"

    # 3) Loose distributional sanity on the generated noise (4096 samples).
    m = float(jnp.mean(eps_k))
    s = float(jnp.std(eps_k))
    assert abs(m) < 0.1, f"noise mean off: {m}"
    assert 0.85 < s < 1.15, f"noise std off: {s}"

    print("KERNEL_OK")
</pallas_src>

<mosaic_0001>
module attributes {stable_mosaic.version = 11 : i64} {
  func.func @_sampler_affine_kernel(%arg0: i32, %arg1: i32, %arg2: memref<16x1xf32, #tpu.memory_space<vmem>>, %arg3: memref<16x1xf32, #tpu.memory_space<vmem>>, %arg4: memref<16x256xf32, #tpu.memory_space<vmem>>, %arg5: memref<16x256xf32, #tpu.memory_space<vmem>>) attributes {dimension_semantics = [#tpu.dimension_semantics<parallel>, #tpu.dimension_semantics<parallel>], iteration_bounds = array<i64: 1, 1>, scalar_prefetch = 0 : i64, scratch_operands = 0 : i64, tpu.core_type = #tpu.core_type<tc>, window_params = [{transform_indices = @transform_0, window_bounds = array<i64: 16, 1>}, {transform_indices = @transform_1, window_bounds = array<i64: 16, 1>}, {transform_indices = @transform_2, window_bounds = array<i64: 16, 256>}, {transform_indices = @transform_3, window_bounds = array<i64: 16, 256>}]} {
    %c0 = arith.constant 0 : index
    %c0_0 = arith.constant 0 : index
    %0 = vector.load %arg2[%c0, %c0_0] : memref<16x1xf32, #tpu.memory_space<vmem>>, vector<16x1xf32>
    %c0_1 = arith.constant 0 : index
    %c0_2 = arith.constant 0 : index
    %1 = vector.load %arg3[%c0_1, %c0_2] : memref<16x1xf32, #tpu.memory_space<vmem>>, vector<16x1xf32>
    %c0_3 = arith.constant 0 : index
    %c0_4 = arith.constant 0 : index
    %2 = vector.load %arg4[%c0_3, %c0_4] : memref<16x256xf32, #tpu.memory_space<vmem>>, vector<16x256xf32>
    %3 = vector.broadcast %1 : vector<16x1xf32> to vector<16x256xf32>
    %4 = arith.mulf %3, %2 : vector<16x256xf32>
    %5 = vector.broadcast %0 : vector<16x1xf32> to vector<16x256xf32>
    %6 = arith.addf %5, %4 : vector<16x256xf32>
    %c0_5 = arith.constant 0 : index
    %c0_6 = arith.constant 0 : index
    %7 = vector.load %arg5[%c0_5, %c0_6] : memref<16x256xf32, #tpu.memory_space<vmem>>, vector<16x256xf32>
    tpu.vector_store %arg5[%c0_5, %c0_6], %6 {strides = array<i32>} : memref<16x256xf32, #tpu.memory_space<vmem>>, vector<16x256xf32>,
    return
  }
  func.func @transform_0(%arg0: i32, %arg1: i32) -> (i32, i32) {
    %c0_i32 = arith.constant 0 : i32
    %c0_i32_0 = arith.constant 0 : i32
    return %arg0, %c0_i32 : i32, i32
  }
  func.func @transform_1(%arg0: i32, %arg1: i32) -> (i32, i32) {
    %c0_i32 = arith.constant 0 : i32
    %c0_i32_0 = arith.constant 0 : i32
    return %arg0, %c0_i32 : i32, i32
  }
  func.func @transform_2(%arg0: i32, %arg1: i32) -> (i32, i32) {
    %c0_i32 = arith.constant 0 : i32
    return %arg0, %arg1 : i32, i32
  }
  func.func @transform_3(%arg0: i32, %arg1: i32) -> (i32, i32) {
    %c0_i32 = arith.constant 0 : i32
    return %arg0, %arg1 : i32, i32
  }
}

</mosaic_0001>

<bundles_post_ra>
// kernel: sampler_normal_pallas.1
= control target key start
LH: loop header
LB: loop body
LE: loop exit
PB: predicated region body
PF: predicated region fallthrough
CT: control target
= control target key end

     0   :  { %v99_v2 = vmov 0   ;;  %s150_s0 = inlined_call_operand.vmem [shape: f32[16,1], index: 0, kind: input, shape index: {}]   ;;  %s151_s1 = inlined_call_operand.vmem [shape: f32[16,1], index: 1, kind: input, shape index: {}]   ;;  %s152_s2 = inlined_call_operand.vmem [shape: f32[16,256], index: 2, kind: input, shape index: {}]   ;;  %s153_s3 = inlined_call_operand.hbm [shape: f32[16,256], index: 3, kind: output, shape index: {}]  }
   0x1   :  { %v17_v0 = vld [vmem:[%s151_s1] sm:$0xff]  ;;  %76 = vset.pattern.permute.xlu1 %v99_v2  ;;  %75 = vset.pattern.permute.xlu0 %v99_v2 }
   0x2   :  { %v15_v1 = vld [vmem:[%s150_s0] sm:$0xff]  ;;  %25 = vperm.xlu0 %75, %v17_v0  }
   0x3   :  { %39 = vperm.xlu1 %76, %v15_v1  }
   0x4   :  { %8 = vsyncpa [#allocation3], 0  ;;  %v18_v3 = vld [vmem:[%s151_s1 + $0x8] sm:$0xff]  ;;  %v19_v5 = vld [vmem:[%s152_s2] sm:$0xff]  ;;  %s100_s26 = smov [#allocation2]  }
   0x5   :  { %v16_v4 = vld [vmem:[%s150_s0 + $0x8] sm:$0xff]  ;;  %v21_v11 = vld [vmem:[%s152_s2 + $0x10] sm:$0xff]  ;;  %v22_v12 = vld [vmem:[%s152_s2 + $0x18] sm:$0xff]  ;;  %s60_s27 = sshll.u32 %s100_s26, 4  ;;  %s61_s27 = int_to_ptr.vmem [resolvable:$true] %s60_s27 }
   0x6   :  { %30 = vperm.xlu0 %75, %v18_v3   ;;  %v20_v6 = vld [vmem:[%s152_s2 + $0x8] sm:$0xff]  ;;  %s77_s28 = scalar_lea.vmem %s61_s27, 512  ;;  %p82_p1 = scmp.lt.s32.totalorder %s61_s27, %s61_s27 }
   0x7   :  { %44 = vperm.xlu1 %76, %v16_v4   ;;  %p78_p0 = scmp.ne.s32.totalorder %s61_s27, %s77_s28  ;;  %p83_p2 = scmp.lt.s32.totalorder %s77_s28, %s77_s28 }
   0x9   :  { %p84_p3 = por %p83_p2, %p82_p1 }
   0xb   :  { %p85_p4 = pnand %p84_p3, %p78_p0 }
  0x7d   :  { %v26_v7 = vpop.permute.xlu0 %25 }
  0x7e   :  { %v40_v8 = vpop.permute.xlu1 %39  ;;  %v33_v9 = vmul.f32 %v26_v7, %v19_v5  ;;  %v34_v10 = vmul.f32 %v26_v7, %v20_v6 }
  0x80   :  { %v47_v13 = vadd.f32 %v40_v8, %v33_v9  ;;  %v48_v14 = vadd.f32 %v40_v8, %v34_v10 }
  0x81   :  { %v31_v15 = vpop.permute.xlu0 %30 }
  0x82   :  { %51 = vst [vmem:[#allocation2] sm:$0xff] %v47_v13  ;;  %52 = vst [vmem:[#allocation2 + $0x8] sm:$0xff] %v48_v14  ;;  %v35_v16 = vmul.f32 %v31_v15, %v21_v11  ;;  %v36_v17 = vmul.f32 %v31_v15, %v22_v12  ;;  %v45_v18 = vpop.permute.xlu1 %44 }
  0x84   :  { %v49_v19 = vadd.f32 %v45_v18, %v35_v16  ;;  %v50_v20 = vadd.f32 %v45_v18, %v36_v17 }
  0x86   :  { %53 = vst [vmem:[#allocation2 + $0x10] sm:$0xff] %v49_v19  ;;  %54 = vst [vmem:[#allocation2 + $0x18] sm:$0xff] %v50_v20 }
  0x87   :  { %88 = shalt.err (!%p85_p4)
}
  0x88   :  { %s101_s2 = smov 256   ;;  %s102_s29 = smov 16  }
  0x89   :  { %66 = dma.vmem_to_hbm [thread:$0]  %s61_s27, 512, %s153_s3, [#allocation3], %s101_s2, %s101_s2, %s102_s29  }
  0x8a   :  { %97 = dma.done.wait [#allocation3], 512  }
  0x8b   :  { %98 = vsyncadd [#allocation3], 4294966784 }
  0x8c   :  { %70 = vsyncpa [#allocation3], 1 }

</bundles_post_ra>
